<compile_context>
chip_gen: v6e
topology: v6e:2x2x1
jax: 0.10.0
libtpu: 0.0.40
codegen_flags: <defaults>
</compile_context>

<pallas_src>
import jax
import jax.numpy as jnp
from jax.experimental import pallas as pl
from jax.experimental.pallas import tpu as pltpu

_LANE = 128
_SUBLANE = 8
_VMEM_LIMIT_BYTES = 48 * 1024 * 1024   # < 64 MiB physical on v7x; ample on v5e/v6e


def _round_up(x, m):
    return (x + m - 1) // m * m


# ----------------------------------------------------------------------------- kernels
def _gen_kernel_plain(z_ref, c_ref, w1z_ref, w1c_ref, b1_ref, w2_ref, b2_ref,
                      x_ref, x1_ref):
    # fc1: concat fused as two bf16 MXU dots with f32 accumulation, + bias.
    h = (jnp.dot(z_ref[...], w1z_ref[...], preferred_element_type=jnp.float32)
         + jnp.dot(c_ref[...], w1c_ref[...], preferred_element_type=jnp.float32)
         + b1_ref[...])
    # LeakyReLU(0.2) == maximum(h, 0.2*h) for a slope in (0, 1): mul + max on VPU.
    x1 = jnp.maximum(h, 0.2 * h)
    x1_bf = x1.astype(jnp.bfloat16)
    x1_ref[...] = x1_bf                                  # self.out (bf16 writeback)
    # fc3 + Sigmoid via tanh identity: single EUP push per output vreg.
    y = jnp.dot(x1_bf, w2_ref[...], preferred_element_type=jnp.float32) + b2_ref[...]
    x_ref[...] = (0.5 * jnp.tanh(0.5 * y) + 0.5).astype(x_ref.dtype)


def _gen_kernel_feedback(z_ref, c_ref, w1z_ref, w1c_ref, b1_ref, w2_ref, b2_ref,
                         a1_ref, fb_ref, x_ref):
    h = (jnp.dot(z_ref[...], w1z_ref[...], preferred_element_type=jnp.float32)
         + jnp.dot(c_ref[...], w1c_ref[...], preferred_element_type=jnp.float32)
         + b1_ref[...])
    x1 = jnp.maximum(h, 0.2 * h)
    # feedback fusion in f32: x1 + a1 * feedback_layers
    fbk = x1 + a1_ref[...].astype(jnp.float32) * fb_ref[...].astype(jnp.float32)
    y = jnp.dot(fbk.astype(jnp.bfloat16), w2_ref[...],
                preferred_element_type=jnp.float32) + b2_ref[...]
    x_ref[...] = (0.5 * jnp.tanh(0.5 * y) + 0.5).astype(x_ref.dtype)


# ----------------------------------------------------------------------------- tiling
def _choose_batch_tile(B, latent, H0p, H1p, with_feedback, block_b):
    """Pick the batch tile from a VMEM budget + megacore considerations."""
    Bp0 = _round_up(B, _SUBLANE)

    # v7x has 2 TensorCores: ensure the "parallel" batch axis has >= 2 grid steps
    # whenever there are enough rows (one extra ~0.35us step elsewhere is noise).
    tb_core = _round_up((Bp0 + 1) // 2, _SUBLANE) if Bp0 >= 2 * _SUBLANE else Bp0

    # Per-row VMEM bytes of the batch-tiled (double-buffered) streams.
    per_row = 2 * 2 * (latent * 2)             # z + c tiles, bf16, 2 buffers each
    per_row += 2 * H1p * 4                     # x tile, f32, 2 buffers
    if with_feedback:
        per_row += 2 * 2 * (H0p * 2)           # a1 + feedback tiles, bf16, 2 buffers
    else:
        per_row += 2 * H0p * 2                 # x1 tile, bf16, 2 buffers
    # Whole-array VMEM-resident weights (single copy, memory_space=VMEM).
    weight_bytes = (2 * latent * H0p + H0p * H1p) * 2 + (H0p + H1p) * 4

    budget = int(0.75 * _VMEM_LIMIT_BYTES) - weight_bytes   # ~25% headroom
    tb_vmem = max(_SUBLANE, budget // max(per_row, 1) // _SUBLANE * _SUBLANE)

    return max(_SUBLANE, min(block_b, tb_core, tb_vmem))


# ----------------------------------------------------------------------------- wrapper
def generator_forward(z, c, params, a1=None, feedback_layers=None, block_b=2048):
    """JAX wrapper mirroring Generator.forward.

    z, c: (B, latent)
    params: dict from init_generator_params (pre-padded, bf16 MXU weights)
    Returns x (and x1 / self.out when feedback_layers is None).
    """
    B, latent = z.shape
    h0, h1 = params["h0"], params["h1"]
    H0p = params["w1z"].shape[1]
    H1p = params["w2"].shape[1]
    with_feedback = feedback_layers is not None

    tb = _choose_batch_tile(B, latent, H0p, H1p, with_feedback, block_b)
    Bp = _round_up(B, tb)
    grid = (Bp // tb,)

    def to_bf16(x, rows, cols):
        # Cast + pad only when actually required; no-ops when the caller already
        # supplies bf16, tile-aligned-batch, lane-dense inputs.
        x = x.astype(jnp.bfloat16)
        pr, pc = rows - x.shape[0], cols - x.shape[1]
        if pr or pc:
            x = jnp.pad(x, ((0, pr), (0, pc)))
        return x

    zp = to_bf16(z, Bp, latent)
    cp = to_bf16(c, Bp, latent)

    def act_spec(feat):
        return pl.BlockSpec((tb, feat), lambda i: (i, 0))

    # Weights / biases: whole-array, VMEM-resident for the entire grid.  Their
    # block never changes, so a single buffer (no double-buffering) is enough.
    wgt_spec = pl.BlockSpec(memory_space=pltpu.MemorySpace.VMEM)
    weight_inputs = (params["w1z"], params["w1c"], params["b1"],
                     params["w2"], params["b2"])
    weight_specs = [wgt_spec] * len(weight_inputs)
    weight_bytes = sum(int(w.size) * w.dtype.itemsize for w in weight_inputs)

    flops = 2 * Bp * (2 * latent * H0p + H0p * H1p)
    cparams = pltpu.CompilerParams(dimension_semantics=("parallel",),
                                   vmem_limit_bytes=_VMEM_LIMIT_BYTES)

    if not with_feedback:
        ce = pl.CostEstimate(
            flops=int(flops),
            transcendentals=int(Bp * H1p),
            bytes_accessed=int((zp.size + cp.size) * 2 + weight_bytes
                               + Bp * H1p * 4 + Bp * H0p * 2))
        x_p, x1_p = pl.pallas_call(
            _gen_kernel_plain,
            grid=grid,
            out_shape=(jax.ShapeDtypeStruct((Bp, H1p), jnp.float32),
                       jax.ShapeDtypeStruct((Bp, H0p), jnp.bfloat16)),
            in_specs=[act_spec(latent), act_spec(latent)] + weight_specs,
            out_specs=(act_spec(H1p), act_spec(H0p)),
            compiler_params=cparams,
            cost_estimate=ce,
        )(zp, cp, *weight_inputs)
        return x_p[:B, :h1], x1_p[:B, :h0]        # x1 mirrors `self.out`
    else:
        # TODO(synk): if a1 is actually a scalar / per-feature gain, pass it as a
        # VMEM-resident (1, H0p) input instead of a full (B, H0p) HBM stream.
        a1p = to_bf16(a1, Bp, H0p)
        fbp = to_bf16(feedback_layers, Bp, H0p)
        ce = pl.CostEstimate(
            flops=int(flops),
            transcendentals=int(Bp * H1p),
            bytes_accessed=int((zp.size + cp.size + a1p.size + fbp.size) * 2
                               + weight_bytes + Bp * H1p * 4))
        x_p = pl.pallas_call(
            _gen_kernel_feedback,
            grid=grid,
            out_shape=jax.ShapeDtypeStruct((Bp, H1p), jnp.float32),
            in_specs=([act_spec(latent), act_spec(latent)] + weight_specs
                      + [act_spec(H0p), act_spec(H0p)]),
            out_specs=act_spec(H1p),
            compiler_params=cparams,
            cost_estimate=ce,
        )(zp, cp, *weight_inputs, a1p, fbp)
        return x_p[:B, :h1]


# ----------------------------------------------------------------------------- params
def init_generator_params(key, latent_size, layer_sizes):
    """weights_init semantics: Linear weight ~ N(0, 0.02), bias = 0.

    Weights are stored (in, out), zero-padded once to lane-dense (multiple-of-128)
    output features, split into the z / c halves (concat fusion), and cast to bf16
    for the MXU.  Biases stay f32 (elementwise path).
    """
    input_size = latent_size * 2
    h0, h1 = layer_sizes
    H0p, H1p = _round_up(h0, _LANE), _round_up(h1, _LANE)

    k1, k2 = jax.random.split(key)
    w1 = 0.02 * jax.random.normal(k1, (input_size, h0), jnp.float32)
    w2 = 0.02 * jax.random.normal(k2, (h0, h1), jnp.float32)

    w1p = jnp.pad(w1, ((0, 0), (0, H0p - h0)))
    w2p = jnp.pad(w2, ((0, H0p - h0), (0, H1p - h1)))

    return {
        "w1z": w1p[:latent_size].astype(jnp.bfloat16),
        "w1c": w1p[latent_size:].astype(jnp.bfloat16),
        "b1": jnp.zeros((1, H0p), jnp.float32),
        "w2": w2p.astype(jnp.bfloat16),
        "b2": jnp.zeros((1, H1p), jnp.float32),
        "h0": h0,
        "h1": h1,
    }


# ----------------------------------------------------------------------------- reference
def _reference_forward(z, c, params, a1=None, feedback_layers=None):
    """Pure-JAX f32 reference using the same bf16-quantized weights/activations."""
    def q(x):  # same bf16 quantization the kernel path applies to activation I/O
        return x.astype(jnp.bfloat16).astype(jnp.float32)

    h0, h1 = params["h0"], params["h1"]
    w1 = jnp.concatenate([params["w1z"], params["w1c"]], axis=0).astype(jnp.float32)[:, :h0]
    w2 = params["w2"].astype(jnp.float32)[:h0, :h1]
    b1 = params["b1"][:, :h0]
    b2 = params["b2"][:, :h1]
    zc = jnp.concatenate([q(z), q(c)], axis=-1)
    h = zc @ w1 + b1
    x1 = jnp.where(h > 0, h, 0.2 * h)
    xf = x1
    if feedback_layers is not None:
        xf = x1 + q(a1) * q(feedback_layers)
    return jax.nn.sigmoid(xf @ w2 + b2), x1


if __name__ == "__main__":
    B, latent = 8, 16
    layer_sizes = [64, 32]

    key = jax.random.PRNGKey(0)
    kz, kc, ka, kf, kp = jax.random.split(key, 5)
    z = jax.random.normal(kz, (B, latent), jnp.float32)
    c = jax.random.normal(kc, (B, latent), jnp.float32)
    a1 = jax.random.normal(ka, (B, layer_sizes[0]), jnp.float32)
    feedback = jax.random.normal(kf, (B, layer_sizes[0]), jnp.float32)
    params = init_generator_params(kp, latent, layer_sizes)

    # plain path (feedback_layers=None) -> returns (x, x1)  [x1 mirrors self.out]
    x_plain, x1_plain = generator_forward(z, c, params)
    jax.block_until_ready((x_plain, x1_plain))

    # feedback path
    x_fb = generator_forward(z, c, params, a1=a1, feedback_layers=feedback)
    jax.block_until_ready(x_fb)

    # correctness check (bf16 MXU operands / bf16 activation I/O -> relaxed tol)
    ref_plain, x1_ref = _reference_forward(z, c, params)
    ref_fb, _ = _reference_forward(z, c, params, a1=a1, feedback_layers=feedback)

    assert x_plain.shape == (B, layer_sizes[1]) and x_plain.dtype == jnp.float32
    assert x1_plain.shape == (B, layer_sizes[0])
    assert x_fb.shape == (B, layer_sizes[1])
    assert jnp.allclose(x_plain, ref_plain, atol=1e-2, rtol=1e-2)
    assert jnp.allclose(x1_plain.astype(jnp.float32), x1_ref, atol=1e-2, rtol=1e-2)
    assert jnp.allclose(x_fb, ref_fb, atol=1e-2, rtol=1e-2)

    print("KERNEL_OK")
</pallas_src>

<mosaic_0001>
module attributes {stable_mosaic.version = 11 : i64} {
  func.func @_gen_kernel_plain(%arg0: i32, %arg1: memref<8x16xbf16, #tpu.memory_space<vmem>>, %arg2: memref<8x16xbf16, #tpu.memory_space<vmem>>, %arg3: memref<16x128xbf16, #tpu.memory_space<vmem>>, %arg4: memref<16x128xbf16, #tpu.memory_space<vmem>>, %arg5: memref<1x128xf32, #tpu.memory_space<vmem>>, %arg6: memref<128x128xbf16, #tpu.memory_space<vmem>>, %arg7: memref<1x128xf32, #tpu.memory_space<vmem>>, %arg8: memref<8x128xf32, #tpu.memory_space<vmem>>, %arg9: memref<8x128xbf16, #tpu.memory_space<vmem>>) attributes {dimension_semantics = [#tpu.dimension_semantics<parallel>], iteration_bounds = array<i64: 1>, scalar_prefetch = 0 : i64, scratch_operands = 0 : i64, tpu.core_type = #tpu.core_type<tc>, window_params = [{transform_indices = @transform_0, window_bounds = array<i64: 8, 16>}, {transform_indices = @transform_1, window_bounds = array<i64: 8, 16>}, {pipeline_mode = #tpu.pipeline_mode<synchronous>, transform_indices = @transform_2, window_bounds = array<i64: 16, 128>}, {pipeline_mode = #tpu.pipeline_mode<synchronous>, transform_indices = @transform_3, window_bounds = array<i64: 16, 128>}, {pipeline_mode = #tpu.pipeline_mode<synchronous>, transform_indices = @transform_4, window_bounds = array<i64: 1, 128>}, {pipeline_mode = #tpu.pipeline_mode<synchronous>, transform_indices = @transform_5, window_bounds = array<i64: 128, 128>}, {pipeline_mode = #tpu.pipeline_mode<synchronous>, transform_indices = @transform_6, window_bounds = array<i64: 1, 128>}, {transform_indices = @transform_7, window_bounds = array<i64: 8, 128>}, {transform_indices = @transform_8, window_bounds = array<i64: 8, 128>}]} {
    %c0 = arith.constant 0 : index
    %c0_0 = arith.constant 0 : index
    %0 = vector.load %arg1[%c0, %c0_0] : memref<8x16xbf16, #tpu.memory_space<vmem>>, vector<8x16xbf16>
    %c0_1 = arith.constant 0 : index
    %c0_2 = arith.constant 0 : index
    %1 = vector.load %arg3[%c0_1, %c0_2] : memref<16x128xbf16, #tpu.memory_space<vmem>>, vector<16x128xbf16>
    %cst = arith.constant dense<0.000000e+00> : vector<8x128xf32>
    %2 = tpu.matmul %0, %1, %cst {dimension_numbers = #tpu.dot_dimension_numbers<[1], [0], [0], [1], [0, 0, 1, 1], [], []>} : vector<8x16xbf16>, vector<16x128xbf16>, vector<8x128xf32> -> vector<8x128xf32>
    %c0_3 = arith.constant 0 : index
    %c0_4 = arith.constant 0 : index
    %3 = vector.load %arg2[%c0_3, %c0_4] : memref<8x16xbf16, #tpu.memory_space<vmem>>, vector<8x16xbf16>
    %c0_5 = arith.constant 0 : index
    %c0_6 = arith.constant 0 : index
    %4 = vector.load %arg4[%c0_5, %c0_6] : memref<16x128xbf16, #tpu.memory_space<vmem>>, vector<16x128xbf16>
    %cst_7 = arith.constant dense<0.000000e+00> : vector<8x128xf32>
    %5 = tpu.matmul %3, %4, %cst_7 {dimension_numbers = #tpu.dot_dimension_numbers<[1], [0], [0], [1], [0, 0, 1, 1], [], []>} : vector<8x16xbf16>, vector<16x128xbf16>, vector<8x128xf32> -> vector<8x128xf32>
    %6 = arith.addf %2, %5 : vector<8x128xf32>
    %c0_8 = arith.constant 0 : index
    %c0_9 = arith.constant 0 : index
    %7 = vector.load %arg5[%c0_8, %c0_9] : memref<1x128xf32, #tpu.memory_space<vmem>>, vector<1x128xf32>
    %8 = vector.broadcast %7 : vector<1x128xf32> to vector<8x128xf32>
    %9 = arith.addf %6, %8 : vector<8x128xf32>
    %cst_10 = arith.constant 2.000000e-01 : f32
    %10 = vector.broadcast %cst_10 : f32 to vector<8x128xf32>
    %11 = arith.mulf %10, %9 : vector<8x128xf32>
    %12 = arith.maximumf %9, %11 : vector<8x128xf32>
    %13 = arith.truncf %12 : vector<8x128xf32> to vector<8x128xbf16>
    %c0_11 = arith.constant 0 : index
    %c0_12 = arith.constant 0 : index
    %14 = vector.load %arg9[%c0_11, %c0_12] : memref<8x128xbf16, #tpu.memory_space<vmem>>, vector<8x128xbf16>
    tpu.vector_store %arg9[%c0_11, %c0_12], %13 {strides = array<i32>} : memref<8x128xbf16, #tpu.memory_space<vmem>>, vector<8x128xbf16>,
    %c0_13 = arith.constant 0 : index
    %c0_14 = arith.constant 0 : index
    %15 = vector.load %arg6[%c0_13, %c0_14] : memref<128x128xbf16, #tpu.memory_space<vmem>>, vector<128x128xbf16>
    %cst_15 = arith.constant dense<0.000000e+00> : vector<8x128xf32>
    %16 = tpu.matmul %13, %15, %cst_15 {dimension_numbers = #tpu.dot_dimension_numbers<[1], [0], [0], [1], [0, 0, 1, 1], [], []>} : vector<8x128xbf16>, vector<128x128xbf16>, vector<8x128xf32> -> vector<8x128xf32>
    %c0_16 = arith.constant 0 : index
    %c0_17 = arith.constant 0 : index
    %17 = vector.load %arg7[%c0_16, %c0_17] : memref<1x128xf32, #tpu.memory_space<vmem>>, vector<1x128xf32>
    %18 = vector.broadcast %17 : vector<1x128xf32> to vector<8x128xf32>
    %19 = arith.addf %16, %18 : vector<8x128xf32>
    %cst_18 = arith.constant 5.000000e-01 : f32
    %20 = vector.broadcast %cst_18 : f32 to vector<8x128xf32>
    %21 = arith.mulf %20, %19 : vector<8x128xf32>
    %22 = math.tanh %21 : vector<8x128xf32>
    %cst_19 = arith.constant 5.000000e-01 : f32
    %23 = vector.broadcast %cst_19 : f32 to vector<8x128xf32>
    %24 = arith.mulf %23, %22 : vector<8x128xf32>
    %cst_20 = arith.constant 5.000000e-01 : f32
    %25 = vector.broadcast %cst_20 : f32 to vector<8x128xf32>
    %26 = arith.addf %24, %25 : vector<8x128xf32>
    %c0_21 = arith.constant 0 : index
    %c0_22 = arith.constant 0 : index
    %27 = vector.load %arg8[%c0_21, %c0_22] : memref<8x128xf32, #tpu.memory_space<vmem>>, vector<8x128xf32>
    tpu.vector_store %arg8[%c0_21, %c0_22], %26 {strides = array<i32>} : memref<8x128xf32, #tpu.memory_space<vmem>>, vector<8x128xf32>,
    return
  }
  func.func @transform_0(%arg0: i32) -> (i32, i32) {
    %c0_i32 = arith.constant 0 : i32
    %c0_i32_0 = arith.constant 0 : i32
    return %arg0, %c0_i32 : i32, i32
  }
  func.func @transform_1(%arg0: i32) -> (i32, i32) {
    %c0_i32 = arith.constant 0 : i32
    %c0_i32_0 = arith.constant 0 : i32
    return %arg0, %c0_i32 : i32, i32
  }
  func.func @transform_2(%arg0: i32) -> (i32, i32) {
    %c0_i32 = arith.constant 0 : i32
    %c0_i32_0 = arith.constant 0 : i32
    %c0_i32_1 = arith.constant 0 : i32
    return %c0_i32, %c0_i32_0 : i32, i32
  }
  func.func @transform_3(%arg0: i32) -> (i32, i32) {
    %c0_i32 = arith.constant 0 : i32
    %c0_i32_0 = arith.constant 0 : i32
    %c0_i32_1 = arith.constant 0 : i32
    return %c0_i32, %c0_i32_0 : i32, i32
  }
  func.func @transform_4(%arg0: i32) -> (i32, i32) {
    %c0_i32 = arith.constant 0 : i32
    %c0_i32_0 = arith.constant 0 : i32
    %c0_i32_1 = arith.constant 0 : i32
    return %c0_i32, %c0_i32_0 : i32, i32
  }
  func.func @transform_5(%arg0: i32) -> (i32, i32) {
    %c0_i32 = arith.constant 0 : i32
    %c0_i32_0 = arith.constant 0 : i32
    %c0_i32_1 = arith.constant 0 : i32
    return %c0_i32, %c0_i32_0 : i32, i32
  }
  func.func @transform_6(%arg0: i32) -> (i32, i32) {
    %c0_i32 = arith.constant 0 : i32
    %c0_i32_0 = arith.constant 0 : i32
    %c0_i32_1 = arith.constant 0 : i32
    return %c0_i32, %c0_i32_0 : i32, i32
  }
  func.func @transform_7(%arg0: i32) -> (i32, i32) {
    %c0_i32 = arith.constant 0 : i32
    %c0_i32_0 = arith.constant 0 : i32
    return %arg0, %c0_i32 : i32, i32
  }
  func.func @transform_8(%arg0: i32) -> (i32, i32) {
    %c0_i32 = arith.constant 0 : i32
    %c0_i32_0 = arith.constant 0 : i32
    return %arg0, %c0_i32 : i32, i32
  }
}

</mosaic_0001>

<bundles_post_ra>
// kernel: tpu_custom_call.1
= control target key start
LH: loop header
LB: loop body
LE: loop exit
PB: predicated region body
PF: predicated region fallthrough
CT: control target
= control target key end

     0   :  { %14 = vsyncpa [#allocation3], 0  ;;  %s683_s0 = inlined_call_operand.hbm [shape: bf16[8,16], index: 0, kind: input, shape index: {}]   ;;  %s684_s1 = inlined_call_operand.hbm [shape: bf16[8,16], index: 1, kind: input, shape index: {}]   ;;  %s685_s2 = inlined_call_operand.hbm [shape: bf16[16,128], index: 2, kind: input, shape index: {}]   ;;  %s686_s3 = inlined_call_operand.hbm [shape: bf16[16,128], index: 3, kind: input, shape index: {}]   ;;  %s687_s4 = inlined_call_operand.vmem [shape: f32[1,128], index: 4, kind: input, shape index: {}]   ;;  %s688_s5 = inlined_call_operand.hbm [shape: bf16[128,128], index: 5, kind: input, shape index: {}]   ;;  %s689_s6 = inlined_call_operand.vmem [shape: f32[1,128], index: 6, kind: input, shape index: {}]   ;;  %s690_s7 = inlined_call_operand.hbm [shape: f32[8,128], index: 7, kind: output, shape index: {0}]   ;;  %s691_s8 = inlined_call_operand.hbm [shape: bf16[8,128], index: 8, kind: output, shape index: {1}]  }
   0x1   :  { %15 = vsyncpa [#allocation6], 0 }
   0x2   :  { %16 = vsyncpa [#allocation9], 0 }
   0x3   :  { %17 = vsyncpa [#allocation4], 0 }
   0x4   :  { %18 = vsyncpa [#allocation13], 0  ;;  %s591_s27 = smov [#allocation5]  }
   0x5   :  { %s35_s28 = sshll.u32 %s591_s27, 4  ;;  %s36_s28 = int_to_ptr.vmem [resolvable:$true] %s35_s28 }
   0x6   :  { %s449_s29 = scalar_lea.vmem %s36_s28, 64  ;;  %p454_p1 = scmp.lt.s32.totalorder %s36_s28, %s36_s28 }
   0x7   :  { %p450_p0 = scmp.ne.s32.totalorder %s36_s28, %s449_s29  ;;  %p455_p2 = scmp.lt.s32.totalorder %s449_s29, %s449_s29 }
   0x9   :  { %p456_p3 = por %p455_p2, %p454_p1 }
   0xb   :  { %p457_p4 = pnand %p456_p3, %p450_p0 }
   0xd   :  { %460 = shalt.err (!%p457_p4)
}
   0xe   :  { %38 = dma.hbm_to_vmem [thread:$0]  %s684_s1, 64, %s36_s28, [#allocation6]  }
   0xf   :  { %s592_s10 = smov [#allocation8]   ;;  %s593_s12 = smov [#allocation2]  }
  0x10   :  { %s56_s11 = sshll.u32 %s592_s10, 4  ;;  %s25_s13 = sshll.u32 %s593_s12, 4  ;;  %s57_s11 = int_to_ptr.vmem [resolvable:$true] %s56_s11  ;;  %s26_s13 = int_to_ptr.vmem [resolvable:$true] %s25_s13 }
  0x11   :  { %s469_s14 = scalar_lea.vmem %s57_s11, 128  ;;  %p474_p6 = scmp.lt.s32.totalorder %s57_s11, %s57_s11 }
  0x12   :  { %p470_p5 = scmp.ne.s32.totalorder %s57_s11, %s469_s14  ;;  %p475_p7 = scmp.lt.s32.totalorder %s469_s14, %s469_s14 }
  0x14   :  { %p476_p8 = por %p475_p7, %p474_p6 }
  0x16   :  { %p477_p9 = pnand %p476_p8, %p470_p5 }
  0x18   :  { %480 = shalt.err (!%p477_p9)
}
  0x19   :  { %s594_s15 = smov 64   ;;  %s595_s16 = smov 4  }
  0x1a   :  { %62 = dma.hbm_to_vmem [thread:$0]  %s686_s3, 128, %s57_s11, [#allocation9], %s594_s15, %s594_s15, %s595_s16  }
  0x1b   :  { %s489_s1 = scalar_lea.vmem %s26_s13, 64  ;;  %p494_p11 = scmp.lt.s32.totalorder %s26_s13, %s26_s13 }
  0x1c   :  { %p490_p10 = scmp.ne.s32.totalorder %s26_s13, %s489_s1  ;;  %p495_p12 = scmp.lt.s32.totalorder %s489_s1, %s489_s1 }
  0x1e   :  { %p496_p13 = por %p495_p12, %p494_p11 }
  0x20   :  { %p497_p0 = pnand %p496_p13, %p490_p10 }
  0x22   :  { %500 = shalt.err (!%p497_p0)
}
  0x23   :  { %28 = dma.hbm_to_vmem [thread:$0]  %s683_s0, 64, %s26_s13, [#allocation3]  }
  0x24   :  { %s596_s21 = smov [#allocation7]   ;;  %s597_s23 = smov [#allocation10]  }
  0x25   :  { %s44_s22 = sshll.u32 %s596_s21, 4  ;;  %s70_s24 = sshll.u32 %s597_s23, 4  ;;  %s45_s22 = int_to_ptr.vmem [resolvable:$true] %s44_s22  ;;  %s71_s24 = int_to_ptr.vmem [resolvable:$true] %s70_s24 }
  0x26   :  { %s509_s25 = scalar_lea.vmem %s45_s22, 128  ;;  %p514_p2 = scmp.lt.s32.totalorder %s45_s22, %s45_s22 }
  0x27   :  { %p510_p1 = scmp.ne.s32.totalorder %s45_s22, %s509_s25  ;;  %p515_p3 = scmp.lt.s32.totalorder %s509_s25, %s509_s25 }
  0x29   :  { %p516_p4 = por %p515_p3, %p514_p2 }
  0x2b   :  { %p517_p5 = pnand %p516_p4, %p510_p1 }
  0x2d   :  { %520 = shalt.err (!%p517_p5)
}
  0x2e   :  { %50 = dma.hbm_to_vmem [thread:$0]  %s685_s2, 128, %s45_s22, [#allocation6], %s594_s15, %s594_s15, %s595_s16  }
  0x2f   :  { %s529_s0 = scalar_lea.vmem %s71_s24, 1024  ;;  %p534_p7 = scmp.lt.s32.totalorder %s71_s24, %s71_s24 }
  0x30   :  { %p530_p6 = scmp.ne.s32.totalorder %s71_s24, %s529_s0  ;;  %p535_p8 = scmp.lt.s32.totalorder %s529_s0, %s529_s0 }
  0x32   :  { %p536_p9 = por %p535_p8, %p534_p7 }
  0x34   :  { %p537_p10 = pnand %p536_p9, %p530_p6 }
  0x36   :  { %540 = shalt.err (!%p537_p10)
}
  0x37   :  { %76 = dma.hbm_to_vmem [thread:$0]  %s688_s5, 1024, %s71_s24, [#allocation9], %s594_s15, %s594_s15, %s595_s16  }
  0x38   :  { %581 = dma.done.wait [#allocation3], 64  }
  0x39   :  { %582 = vsyncadd [#allocation3], 4294967232 }
  0x3a   :  { %583 = dma.done.wait [#allocation6], 192  }
  0x3b   :  { %584 = vsyncadd [#allocation6], 4294967104 }
  0x3c   :  { %585 = dma.done.wait [#allocation9], 1152  }
  0x3d   :  { %586 = vsyncadd [#allocation9], 4294966144  ;;  %v598_v0 = vmov 0.0   ;;  %vm599_vm0 = vmmov 0   ;;  %v429_v1 = vld [vmem:[#allocation8] sm:$0xff]   ;;  %vm107_vm1 = vcmask 130048  }
  0x3e   :  { %386 = vmatprep.subr.bf16.mxu1 %v598_v0  ;;  %388 = vmatprep.mubr.msk.bf16.mxu1 %vm599_vm0, %v598_v0  ;;  %v98_v2 = vld [vmem:[#allocation5] sm:$0xf]  ;;  %v430_v3 = vld [vmem:[#allocation7] sm:$0xff]   ;;  %v431_v4 = vld [vmem:[#allocation10 + $0x38] sm:$0xff]   ;;  %s600_s29 = smov [#allocation12]  }
  0x3f   :  { %398 = vmatprep.subr.bf16.mxu0 %v598_v0  ;;  %414 = vmatprep.mubr.msk.bf16.mxu0 %vm599_vm0, %v598_v0  ;;  %v432_v5 = vld [vmem:[#allocation10 + $0x30] sm:$0xff]   ;;  %v433_v6 = vld [vmem:[#allocation10 + $0x28] sm:$0xff]   ;;  %v434_v8 = vld [vmem:[#allocation10 + $0x20] sm:$0xff]   ;;  %s344_s30 = sshll.u32 %s600_s29, 4  ;;  %s345_s30 = int_to_ptr.vmem [resolvable:$true] %s344_s30 }
  0x40   :  { %387 = vmatpush3.bf16.msra.mxu1 %v429_v1  ;;  %399 = vmatpush3.bf16.msra.mxu0 %v431_v4  ;;  %v95_v7 = vld [vmem:[#allocation2] sm:$0xf]  ;;  %v435_v9 = vld [vmem:[#allocation10 + $0x18] sm:$0xff]   ;;  %v436_v10 = vld [vmem:[#allocation10 + $0x10] sm:$0xff]   ;;  %s541_s9 = scalar_lea.vmem %s345_s30, 64  ;;  %p546_p12 = scmp.lt.s32.totalorder %s345_s30, %s345_s30 }
  0x41   :  { %392 = vmatprep.subr.bf16.mxu1 %v598_v0  ;;  %400 = vmatprep.subr.bf16.mxu0 %v598_v0  ;;  %v437_v11 = vld [vmem:[#allocation10 + $0x8] sm:$0xff]   ;;  %v438_v12 = vld [vmem:[#allocation10] sm:$0xff]   ;;  %p542_p11 = scmp.ne.s32.totalorder %s345_s30, %s541_s9  ;;  %p547_p13 = scmp.lt.s32.totalorder %s541_s9, %s541_s9 }
  0x42   :  { %v363_v18 = vld [vmem:[%s687_s4] ss:$0 sm:$0xff] }
  0x43   :  { %389 = vmatmul.mubr.msk.bf16.vlgmr.msra.gmra.mxu1 %vm107_vm1, %v98_v2  ;;  %p548_p0 = por %p547_p13, %p546_p12 }
  0x44   :  { %393 = vmatpush3.bf16.msra.mxu1 %v430_v3  ;;  %394 = vmatprep.mubr.msk.bf16.mxu1 %vm599_vm0, %v598_v0 }
  0x45   :  { %401 = vmatpush3.bf16.msra.mxu0 %v432_v5  ;;  %p549_p1 = pnand %p548_p0, %p542_p11 }
  0x46   :  { %402 = vmatprep.subr.bf16.mxu0 %v598_v0 }
  0x49   :  { %403 = vmatpush3.bf16.msra.mxu0 %v433_v6 }
  0x4a   :  { %404 = vmatprep.subr.bf16.mxu0 %v598_v0 }
  0x4b   :  { %395 = vmatmul.mubr.msk.bf16.vlgmr.msra.gmra.mxu1 %vm107_vm1, %v95_v7 }
  0x4d   :  { %405 = vmatpush3.bf16.msra.mxu0 %v434_v8 }
  0x4e   :  { %406 = vmatprep.subr.bf16.mxu0 %v598_v0 }
  0x51   :  { %407 = vmatpush3.bf16.msra.mxu0 %v435_v9 }
  0x52   :  { %408 = vmatprep.subr.bf16.mxu0 %v598_v0 }
  0x55   :  { %409 = vmatpush3.bf16.msra.mxu0 %v436_v10 }
  0x56   :  { %410 = vmatprep.subr.bf16.mxu0 %v598_v0 }
  0x59   :  { %411 = vmatpush3.bf16.msra.mxu0 %v437_v11 }
  0x5a   :  { %412 = vmatprep.subr.bf16.mxu0 %v598_v0 }
  0x5d   :  { %413 = vmatpush3.bf16.msra.mxu0 %v438_v12 }
 0x103   :  { %v145_v13 = vpop.f32.mrf.mxu1 }
 0x105   :  { %v390_v14 = vpop.f32.mrf.mxu1 }
 0x107   :  { %v148_v15 = vpop.f32.mrf.mxu1 }
 0x109   :  { %v391_v16 = vpop.f32.mrf.mxu1 }
 0x10b   :  { %v194_v17 = vpop.f32.mrf.mxu1 }
 0x10c   :  { %v195_v19 = vadd.f32 %v194_v17, %v145_v13 }
 0x10d   :  { %v396_v20 = vpop.f32.mrf.mxu1 }
 0x10e   :  { %v207_v21 = vadd.f32 %v363_v18, %v195_v19 }
 0x10f   :  { %v197_v22 = vpop.f32.mrf.mxu1 }
 0x110   :  { %v208_v23 = vmul.f32 0.2, %v207_v21 }
 0x111   :  { %v397_v24 = vpop.f32.mrf.mxu1 }
 0x112   :  { %v209_v25 = vmax.f32 %v207_v21, %v208_v23 }
 0x114   :  { %v210_v26 = vpack.c.bf16 %v209_v25, %v209_v25 }
 0x116   :  { %415 = vmatmul.mubr.bf16.vlgmr.msra.gmra.mxu0 %v210_v26  ;;  %211 = vst [vmem:[#allocation12] sm:$0xf] %v210_v26 }
 0x117   :  { %552 = shalt.err (!%p549_p1)
}
 0x118   :  { %347 = dma.vmem_to_hbm [thread:$0]  %s345_s30, 64, %s691_s8, [#allocation13]   ;;  %v364_v27 = vld [vmem:[%s689_s6] ss:$0 sm:$0xff] }
 0x119   :  { %s601_s13 = smov [#allocation11]  }
 0x11a   :  { %s334_s14 = sshll.u32 %s601_s13, 4  ;;  %s335_s14 = int_to_ptr.vmem [resolvable:$true] %s334_s14 }
 0x11b   :  { %s561_s15 = scalar_lea.vmem %s335_s14, 128  ;;  %p566_p3 = scmp.lt.s32.totalorder %s335_s14, %s335_s14 }
 0x11c   :  { %p562_p2 = scmp.ne.s32.totalorder %s335_s14, %s561_s15  ;;  %p567_p4 = scmp.lt.s32.totalorder %s561_s15, %s561_s15 }
 0x11e   :  { %p568_p5 = por %p567_p4, %p566_p3 }
 0x120   :  { %p569_p6 = pnand %p568_p5, %p562_p2 }
 0x1d6   :  { %v317_v28 = vpop.f32.mrf.mxu0 }
 0x1d7   :  { %v318_v29 = vadd.f32 %v364_v27, %v317_v28 }
 0x1d8   :  { %v416_v30 = vpop.f32.mrf.mxu0 }
 0x1d9   :  { %v323_v31 = vmul.f32 0.5, %v318_v29 }
 0x1da   :  { %v320_v32 = vpop.f32.mrf.mxu0 }
 0x1db   :  { %439 = vtanh.f32 %v323_v31 }
 0x1dc   :  { %v417_v33 = vpop.f32.mrf.mxu0 }
 0x1e8   :  { %v440_v34 = vpop.eup %439 }
 0x1e9   :  { %v325_v35 = vmul.f32 0.5, %v440_v34 }
 0x1eb   :  { %v326_v36 = vadd.f32 0.5, %v325_v35 }
 0x1ed   :  { %327 = vst [vmem:[#allocation11] sm:$0xff] %v326_v36 }
 0x1ee   :  { %572 = shalt.err (!%p569_p6)
}
 0x1ef   :  { %337 = dma.vmem_to_hbm [thread:$0]  %s335_s14, 128, %s690_s7, [#allocation4]  }
 0x1f0   :  { %587 = dma.done.wait [#allocation4], 128  }
 0x1f1   :  { %588 = vsyncadd [#allocation4], 4294967168 }
 0x1f2   :  { %589 = dma.done.wait [#allocation13], 64  }
 0x1f3   :  { %590 = vsyncadd [#allocation13], 4294967232 }
 0x1f4   :  { %354 = vsyncpa [#allocation3], 1 }
 0x1f5   :  { %355 = vsyncpa [#allocation6], 1 }
 0x1f6   :  { %356 = vsyncpa [#allocation9], 1 }
 0x1f7   :  { %357 = vsyncpa [#allocation4], 1 }
 0x1f8   :  { %358 = vsyncpa [#allocation13], 1 }

</bundles_post_ra>
